<compile_context>
chip_gen: v7x
topology: tpu7x:2x2x1
jax: 0.10.0
libtpu: 0.0.40
codegen_flags: <defaults>
</compile_context>

<pallas_src>
import functools

import jax
import jax.numpy as jnp
from jax.experimental import pallas as pl
from jax.experimental.pallas import tpu as pltpu

KSIZE = 3
CONV_PAD = 2


def _round_up(x, m):
    return (x + m - 1) // m * m


# ---------------- kernel 1: conv + encoder + decoder-front (tiny, VMEM-resident) -----
def encoder_kernel(xcol_ref, cw_ref, cb_ref,
                   w1_ref, b1_ref, w2_ref, b2_ref, w3_ref, b3_ref,
                   w4_ref, b4_ref, w5_ref, b5_ref, h_ref):
    # xcol_ref : (B, C*K, Lp) bf16  im2col taps (Lout zero-padded to Lp)
    # cw_ref   : (C*K, 1)     f32   bf16-rounded flattened Conv1d weight
    # cb_ref   : (1,)         f32   conv bias (SMEM scalar)
    # wN_ref   : (in, out)    bf16  2-D Linear weights (no batch broadcast)
    # bN_ref   : (1, out)     f32
    # h_ref    : (B, hidden)  bf16  activation feeding the streamed decoder head

    # Conv1DLatent (out_channels=1) as VPU multiply + cross-sublane reduce over the
    # C*K taps; the batch stays on the M/sublane axis, never an M=1 MXU matmul.
    taps = xcol_ref[...].astype(jnp.float32)            # (B, C*K, Lp)
    conv = jnp.sum(taps * cw_ref[...], axis=1)          # (B, Lp) f32
    conv = conv + cb_ref[0]                             # bias added before bf16 round

    def layer(a_f32, w_ref, b_ref, relu):
        y = jnp.dot(a_f32.astype(jnp.bfloat16), w_ref[...],
                    preferred_element_type=jnp.float32) + b_ref[...]
        return jnp.maximum(y, 0.0) if relu else y

    h = layer(conv, w1_ref, b1_ref, True)    # encoder Linear(conv_out, hidden) + ReLU
    h = layer(h, w2_ref, b2_ref, True)       # encoder Linear(hidden, mid)      + ReLU
    h = layer(h, w3_ref, b3_ref, False)      # encoder Linear(mid, latent)
    h = layer(h, w4_ref, b4_ref, True)       # decoder Linear(latent, mid)      + ReLU
    h = layer(h, w5_ref, b5_ref, True)       # decoder Linear(mid, hidden)      + ReLU
    h_ref[...] = h.astype(h_ref.dtype)


# ---------------- kernel 2: decoder head, streaming w6 column tiles ------------------
def decoder_head_kernel(h_ref, w6_ref, b6_ref, out_ref):
    # h_ref  : (B, hidden)   bf16  resident (same block every grid step)
    # w6_ref : (hidden, TN)  bf16  streamed multi-MB column tile
    # b6_ref : (1, TN)       f32
    # out_ref: (B, TN)       bf16  lane-dense output tile
    acc = jnp.dot(h_ref[...], w6_ref[...], preferred_element_type=jnp.float32)
    out_ref[...] = (acc + b6_ref[...]).astype(out_ref.dtype)


# --------------------------------- tiling / budgets -----------------------------------
def _decoder_tiling(hidden, n_pad):
    """Per-generation column tile width + buffer depth for the w6 stream."""
    kind = jax.devices()[0].device_kind.lower()
    if "v5" in kind:          # ~0.8 TB/s HBM, 128 MiB VMEM
        target_bytes, bufs, min_steps = 2 << 20, 3, 1
    elif "v6" in kind:        # ~1.4 TB/s HBM, 128 MiB VMEM
        target_bytes, bufs, min_steps = 4 << 20, 3, 1
    else:                     # v7x (and unknown): ~3.2 TB/s, 64 MiB VMEM/TC, 2 TCs
        target_bytes, bufs, min_steps = 8 << 20, 2, 4
    tn = max(128, (target_bytes // (hidden * 2)) // 128 * 128)   # multi-MB bf16 DMA
    tn = min(tn, n_pad)
    tn = min(tn, max(128, (n_pad // min_steps) // 128 * 128))    # >=min_steps for 2 TCs
    while n_pad % tn:                                            # tn must divide n_pad
        tn -= 128
    steps = n_pad // tn
    bufs = max(2, min(bufs, steps))
    return tn, bufs


def _decoder_vmem_limit(b, hidden, tn, bufs):
    """Scoped-VMEM budget from actual tile sizes (sublane-padded) + headroom."""
    w6_tile = hidden * tn * 2
    b6_tile = 8 * tn * 4
    out_tile = max(b, 8) * tn * 2
    h_res = 2 * max(b, 8) * max(hidden, 128) * 2
    return min(bufs * (w6_tile + b6_tile) + 2 * out_tile + h_res + (8 << 20), 56 << 20)


# --------------------------------- wrappers ------------------------------------------
def _im2col(x, lout, lp):
    """x: (B, C, L) f32 NCL -> (B, C*K, Lp) bf16 with xcol[b, c*K+k, l] = x_pad[b, c, l+k]."""
    b, c, _ = x.shape
    xb = x.astype(jnp.bfloat16)                         # bf16 before pad/stack
    xp = jnp.pad(xb, ((0, 0), (0, 0), (CONV_PAD, CONV_PAD)))
    taps = jnp.stack([xp[:, :, k:k + lout] for k in range(KSIZE)], axis=2)
    xcol = taps.reshape(b, c * KSIZE, lout)
    return jnp.pad(xcol, ((0, 0), (0, 0), (0, lp - lout)))


def prepare_params(p):
    """One-time prep of the f32 master params: bf16 2-D weights (no batch broadcast),
    f32 biases, w1 rows zero-padded, w6/b6 columns padded ONCE to a 128-multiple."""
    c, k = p["conv_w"].shape
    lout, hidden = p["w1"].shape
    lp = _round_up(lout, 128)
    prep = {
        "cw": p["conv_w"].astype(jnp.bfloat16).astype(jnp.float32).reshape(c * k, 1),
        "cb": p["conv_b"].reshape(-1).astype(jnp.float32),
        "w1": jnp.zeros((lp, hidden), jnp.float32).at[:lout].set(p["w1"]).astype(jnp.bfloat16),
        "b1": p["b1"].reshape(1, -1).astype(jnp.float32),
    }
    for i in (2, 3, 4, 5):
        prep[f"w{i}"] = p[f"w{i}"].astype(jnp.bfloat16)
        prep[f"b{i}"] = p[f"b{i}"].reshape(1, -1).astype(jnp.float32)
    n_out = p["w6"].shape[1]
    n_pad = _round_up(n_out, 128)
    w6 = p["w6"].astype(jnp.bfloat16)
    b6 = p["b6"].reshape(1, -1).astype(jnp.float32)
    if n_pad != n_out:                                   # done once, never per call
        w6 = jnp.pad(w6, ((0, 0), (0, n_pad - n_out)))
        b6 = jnp.pad(b6, ((0, 0), (0, n_pad - n_out)))
    prep["w6"], prep["b6"] = w6, b6
    return prep


@functools.partial(jax.jit, static_argnames=("tn", "bufs"))
def _forward(x, prep, *, tn, bufs):
    b, _, l = x.shape
    lout = l + 2 * CONV_PAD - KSIZE + 1
    lp = prep["w1"].shape[0]
    hidden = prep["w5"].shape[1]
    n_pad = prep["w6"].shape[1]
    xcol = _im2col(x, lout, lp)

    # ---- kernel 1: conv + encoder + decoder-front (all operands tiny, VMEM-resident)
    vmem = pl.BlockSpec(memory_space=pltpu.MemorySpace.VMEM)
    smem = pl.BlockSpec(memory_space=pltpu.MemorySpace.SMEM)
    enc_args = (xcol, prep["cw"], prep["cb"],
                prep["w1"], prep["b1"], prep["w2"], prep["b2"], prep["w3"], prep["b3"],
                prep["w4"], prep["b4"], prep["w5"], prep["b5"])
    h = pl.pallas_call(
        encoder_kernel,
        out_shape=jax.ShapeDtypeStruct((b, hidden), jnp.bfloat16),
        in_specs=[vmem, vmem, smem] + [vmem] * 10,
        out_specs=vmem,
        compiler_params=pltpu.CompilerParams(vmem_limit_bytes=32 << 20),
    )(*enc_args)

    # ---- kernel 2: stream w6 in multi-MB lane-dense column tiles ---------------------
    out = pl.pallas_call(
        decoder_head_kernel,
        out_shape=jax.ShapeDtypeStruct((b, n_pad), jnp.bfloat16),
        grid=(n_pad // tn,),
        in_specs=[
            pl.BlockSpec((b, hidden), lambda j: (0, 0)),              # h stays resident
            pl.BlockSpec((hidden, tn), lambda j: (0, j),
                         pipeline_mode=pl.Buffered(bufs)),            # streamed w6 tiles
            pl.BlockSpec((1, tn), lambda j: (0, j)),
        ],
        out_specs=pl.BlockSpec((b, tn), lambda j: (0, j)),
        compiler_params=pltpu.CompilerParams(
            dimension_semantics=("parallel",),        # shard columns across v7x's 2 TCs
            vmem_limit_bytes=_decoder_vmem_limit(b, hidden, tn, bufs)),
    )(h, prep["w6"], prep["b6"])
    return out


def auto_state_encoder(x, prep, n_out=None):
    """x: (B, C=hidden_dim, L=seq_len) NCL. Returns (B, seq_len*hidden_dim) bf16."""
    hidden = prep["w5"].shape[1]
    n_pad = prep["w6"].shape[1]
    tn, bufs = _decoder_tiling(hidden, n_pad)         # per-generation static config
    out = _forward(x, prep, tn=tn, bufs=bufs)
    if n_out is not None and n_out != n_pad:
        out = out[:, :n_out]
    return out


# --------------------------- pure-JAX reference --------------------------------------
def reference(x, params):
    """Original AutoStateEncoder semantics in plain JAX, same bf16 weight/activation
    precision as the kernels (f32 accumulation)."""
    f32 = jnp.float32
    cw = params["conv_w"].astype(jnp.bfloat16).astype(f32)
    xp = jnp.pad(x, ((0, 0), (0, 0), (CONV_PAD, CONV_PAD)))
    xp = xp.astype(jnp.bfloat16).astype(f32)
    lout = xp.shape[2] - KSIZE + 1
    conv = sum(jnp.einsum("bcl,c->bl", xp[:, :, k:k + lout], cw[:, k])
               for k in range(KSIZE)) + params["conv_b"][0, 0]

    def lin(a, w, bias):
        a16 = a.astype(jnp.bfloat16).astype(f32)
        w16 = w.astype(jnp.bfloat16).astype(f32)
        return a16 @ w16 + bias

    h = jax.nn.relu(lin(conv, params["w1"], params["b1"]))
    h = jax.nn.relu(lin(h, params["w2"], params["b2"]))
    latent = lin(h, params["w3"], params["b3"])
    h = jax.nn.relu(lin(latent, params["w4"], params["b4"]))
    h = jax.nn.relu(lin(h, params["w5"], params["b5"]))
    return lin(h, params["w6"], params["b6"]).astype(jnp.bfloat16)


# ------------------------------------ setup ------------------------------------------
def init_params(key, *, in_channels, seq_len, hidden_dim, latent_dim, mid_dim):
    """f32 master params mirroring AutoStateEncoder (Conv1DLatent modeled as
    Conv1d(in_channels, 1, 3, padding=2) so conv_out = seq_len + 2, the scaled 1026)."""
    conv_out = seq_len + 2 * CONV_PAD - KSIZE + 1
    dims = [(conv_out, hidden_dim), (hidden_dim, mid_dim), (mid_dim, latent_dim),
            (latent_dim, mid_dim), (mid_dim, hidden_dim),
            (hidden_dim, seq_len * hidden_dim)]
    keys = jax.random.split(key, 2 + 2 * len(dims))
    params = {
        "conv_w": jax.random.normal(keys[0], (in_channels, KSIZE), jnp.float32)
                  / jnp.sqrt(in_channels * KSIZE),
        "conv_b": 0.1 * jax.random.normal(keys[1], (1, 1), jnp.float32),
    }
    for i, (din, dout) in enumerate(dims, start=1):
        params[f"w{i}"] = (jax.random.normal(keys[2 * i], (din, dout), jnp.float32)
                           / jnp.sqrt(din))
        params[f"b{i}"] = 0.1 * jax.random.normal(keys[2 * i + 1], (1, dout), jnp.float32)
    return params


if __name__ == "__main__":
    B, hidden_dim, seq_len, latent_dim, mid_dim = 2, 64, 8, 16, 64
    key = jax.random.PRNGKey(0)
    k_x, k_p = jax.random.split(key)
    # layout: (B, C=hidden_dim, L=seq_len), PyTorch Conv1d NCL
    x = jax.random.normal(k_x, (B, hidden_dim, seq_len), jnp.float32)
    params = init_params(k_p, in_channels=hidden_dim, seq_len=seq_len,
                         hidden_dim=hidden_dim, latent_dim=latent_dim, mid_dim=mid_dim)
    prep = prepare_params(params)
    ref = reference(x, params)

    # per-generation auto-tuned tiling (the perf path)
    out = jax.block_until_ready(auto_state_encoder(x, prep))
    # forced 4-step grid: exercises the streamed / multi-buffered w6 path at demo scale
    out_stream = jax.block_until_ready(_forward(x, prep, tn=128, bufs=2))

    for o in (out, out_stream):
        assert o.shape == (B, seq_len * hidden_dim)
        assert o.dtype == jnp.bfloat16
        err = jnp.max(jnp.abs(o.astype(jnp.float32) - ref.astype(jnp.float32)))
        assert jnp.allclose(o.astype(jnp.float32), ref.astype(jnp.float32),
                            atol=3e-2, rtol=3e-2), f"max abs err {err}"
    print("KERNEL_OK")
</pallas_src>

<mosaic_0001>
module attributes {stable_mosaic.version = 11 : i64} {
  func.func @decoder_head_kernel(%arg0: i32, %arg1: memref<2x64xbf16, #tpu.memory_space<vmem>>, %arg2: memref<64x128xbf16, #tpu.memory_space<vmem>>, %arg3: memref<1x128xf32, #tpu.memory_space<vmem>>, %arg4: memref<2x128xbf16, #tpu.memory_space<vmem>>) attributes {dimension_semantics = [#tpu.dimension_semantics<parallel>], iteration_bounds = array<i64: 4>, scalar_prefetch = 0 : i64, scratch_operands = 0 : i64, tpu.core_type = #tpu.core_type<tc>, window_params = [{pipeline_mode = #tpu.pipeline_mode<synchronous>, transform_indices = @transform_0, window_bounds = array<i64: 2, 64>}, {pipeline_mode = #tpu.pipeline_mode<double_buffered>, transform_indices = @transform_1, window_bounds = array<i64: 64, 128>}, {transform_indices = @transform_2, window_bounds = array<i64: 1, 128>}, {transform_indices = @transform_3, window_bounds = array<i64: 2, 128>}]} {
    %c0 = arith.constant 0 : index
    %c0_0 = arith.constant 0 : index
    %0 = vector.load %arg1[%c0, %c0_0] : memref<2x64xbf16, #tpu.memory_space<vmem>>, vector<2x64xbf16>
    %c0_1 = arith.constant 0 : index
    %c0_2 = arith.constant 0 : index
    %1 = vector.load %arg2[%c0_1, %c0_2] : memref<64x128xbf16, #tpu.memory_space<vmem>>, vector<64x128xbf16>
    %cst = arith.constant dense<0.000000e+00> : vector<2x128xf32>
    %2 = tpu.matmul %0, %1, %cst {dimension_numbers = #tpu.dot_dimension_numbers<[1], [0], [0], [1], [0, 0, 1, 1], [], []>} : vector<2x64xbf16>, vector<64x128xbf16>, vector<2x128xf32> -> vector<2x128xf32>
    %c0_3 = arith.constant 0 : index
    %c0_4 = arith.constant 0 : index
    %3 = vector.load %arg3[%c0_3, %c0_4] : memref<1x128xf32, #tpu.memory_space<vmem>>, vector<1x128xf32>
    %4 = vector.broadcast %3 : vector<1x128xf32> to vector<2x128xf32>
    %5 = arith.addf %2, %4 : vector<2x128xf32>
    %6 = arith.truncf %5 : vector<2x128xf32> to vector<2x128xbf16>
    %c0_5 = arith.constant 0 : index
    %c0_6 = arith.constant 0 : index
    %7 = vector.load %arg4[%c0_5, %c0_6] : memref<2x128xbf16, #tpu.memory_space<vmem>>, vector<2x128xbf16>
    tpu.vector_store %arg4[%c0_5, %c0_6], %6 {strides = array<i32>} : memref<2x128xbf16, #tpu.memory_space<vmem>>, vector<2x128xbf16>,
    return
  }
  func.func @transform_0(%arg0: i32) -> (i32, i32) {
    %c0_i32 = arith.constant 0 : i32
    %c0_i32_0 = arith.constant 0 : i32
    %c0_i32_1 = arith.constant 0 : i32
    return %c0_i32, %c0_i32_0 : i32, i32
  }
  func.func @transform_1(%arg0: i32) -> (i32, i32) {
    %c0_i32 = arith.constant 0 : i32
    %c0_i32_0 = arith.constant 0 : i32
    return %c0_i32, %arg0 : i32, i32
  }
  func.func @transform_2(%arg0: i32) -> (i32, i32) {
    %c0_i32 = arith.constant 0 : i32
    %c0_i32_0 = arith.constant 0 : i32
    return %c0_i32, %arg0 : i32, i32
  }
  func.func @transform_3(%arg0: i32) -> (i32, i32) {
    %c0_i32 = arith.constant 0 : i32
    %c0_i32_0 = arith.constant 0 : i32
    return %c0_i32, %arg0 : i32, i32
  }
}

module attributes {stable_mosaic.version = 11 : i64} {
  func.func @encoder_kernel(%arg0: memref<2x192x128xbf16, #tpu.memory_space<vmem>>, %arg1: memref<192x1xf32, #tpu.memory_space<vmem>>, %arg2: memref<1xf32, #tpu.memory_space<smem>>, %arg3: memref<128x64xbf16, #tpu.memory_space<vmem>>, %arg4: memref<1x64xf32, #tpu.memory_space<vmem>>, %arg5: memref<64x64xbf16, #tpu.memory_space<vmem>>, %arg6: memref<1x64xf32, #tpu.memory_space<vmem>>, %arg7: memref<64x16xbf16, #tpu.memory_space<vmem>>, %arg8: memref<1x16xf32, #tpu.memory_space<vmem>>, %arg9: memref<16x64xbf16, #tpu.memory_space<vmem>>, %arg10: memref<1x64xf32, #tpu.memory_space<vmem>>, %arg11: memref<64x64xbf16, #tpu.memory_space<vmem>>, %arg12: memref<1x64xf32, #tpu.memory_space<vmem>>, %arg13: memref<2x64xbf16, #tpu.memory_space<vmem>>) attributes {dimension_semantics = [], scalar_prefetch = 0 : i64, scratch_operands = 0 : i64, tpu.core_type = #tpu.core_type<tc>} {
    %c0 = arith.constant 0 : index
    %c0_0 = arith.constant 0 : index
    %c0_1 = arith.constant 0 : index
    %0 = vector.load %arg0[%c0, %c0_0, %c0_1] : memref<2x192x128xbf16, #tpu.memory_space<vmem>>, vector<2x192x128xbf16>
    %1 = arith.extf %0 : vector<2x192x128xbf16> to vector<2x192x128xf32>
    %c0_2 = arith.constant 0 : index
    %c0_3 = arith.constant 0 : index
    %2 = vector.load %arg1[%c0_2, %c0_3] : memref<192x1xf32, #tpu.memory_space<vmem>>, vector<192x1xf32>
    %3 = vector.shape_cast %2 : vector<192x1xf32> to vector<1x192x1xf32>
    %4 = vector.broadcast %3 : vector<1x192x1xf32> to vector<2x192x128xf32>
    %5 = arith.mulf %1, %4 : vector<2x192x128xf32>
    %cst = arith.constant dense<0.000000e+00> : vector<2x128xf32>
    %6 = vector.multi_reduction <add>, %5, %cst [1] : vector<2x192x128xf32> to vector<2x128xf32>
    %c0_4 = arith.constant 0 : index
    %7 = memref.load %arg2[%c0_4] : memref<1xf32, #tpu.memory_space<smem>>
    %8 = vector.broadcast %7 : f32 to vector<2x128xf32>
    %9 = arith.addf %6, %8 : vector<2x128xf32>
    %10 = arith.truncf %9 : vector<2x128xf32> to vector<2x128xbf16>
    %c0_5 = arith.constant 0 : index
    %c0_6 = arith.constant 0 : index
    %11 = vector.load %arg3[%c0_5, %c0_6] : memref<128x64xbf16, #tpu.memory_space<vmem>>, vector<128x64xbf16>
    %cst_7 = arith.constant dense<0.000000e+00> : vector<2x64xf32>
    %12 = tpu.matmul %10, %11, %cst_7 {dimension_numbers = #tpu.dot_dimension_numbers<[1], [0], [0], [1], [0, 0, 1, 1], [], []>} : vector<2x128xbf16>, vector<128x64xbf16>, vector<2x64xf32> -> vector<2x64xf32>
    %c0_8 = arith.constant 0 : index
    %c0_9 = arith.constant 0 : index
    %13 = vector.load %arg4[%c0_8, %c0_9] : memref<1x64xf32, #tpu.memory_space<vmem>>, vector<1x64xf32>
    %14 = vector.broadcast %13 : vector<1x64xf32> to vector<2x64xf32>
    %15 = arith.addf %12, %14 : vector<2x64xf32>
    %cst_10 = arith.constant 0.000000e+00 : f32
    %16 = vector.broadcast %cst_10 : f32 to vector<2x64xf32>
    %17 = arith.maximumf %15, %16 : vector<2x64xf32>
    %18 = arith.truncf %17 : vector<2x64xf32> to vector<2x64xbf16>
    %c0_11 = arith.constant 0 : index
    %c0_12 = arith.constant 0 : index
    %19 = vector.load %arg5[%c0_11, %c0_12] : memref<64x64xbf16, #tpu.memory_space<vmem>>, vector<64x64xbf16>
    %cst_13 = arith.constant dense<0.000000e+00> : vector<2x64xf32>
    %20 = tpu.matmul %18, %19, %cst_13 {dimension_numbers = #tpu.dot_dimension_numbers<[1], [0], [0], [1], [0, 0, 1, 1], [], []>} : vector<2x64xbf16>, vector<64x64xbf16>, vector<2x64xf32> -> vector<2x64xf32>
    %c0_14 = arith.constant 0 : index
    %c0_15 = arith.constant 0 : index
    %21 = vector.load %arg6[%c0_14, %c0_15] : memref<1x64xf32, #tpu.memory_space<vmem>>, vector<1x64xf32>
    %22 = vector.broadcast %21 : vector<1x64xf32> to vector<2x64xf32>
    %23 = arith.addf %20, %22 : vector<2x64xf32>
    %cst_16 = arith.constant 0.000000e+00 : f32
    %24 = vector.broadcast %cst_16 : f32 to vector<2x64xf32>
    %25 = arith.maximumf %23, %24 : vector<2x64xf32>
    %26 = arith.truncf %25 : vector<2x64xf32> to vector<2x64xbf16>
    %c0_17 = arith.constant 0 : index
    %c0_18 = arith.constant 0 : index
    %27 = vector.load %arg7[%c0_17, %c0_18] : memref<64x16xbf16, #tpu.memory_space<vmem>>, vector<64x16xbf16>
    %cst_19 = arith.constant dense<0.000000e+00> : vector<2x16xf32>
    %28 = tpu.matmul %26, %27, %cst_19 {dimension_numbers = #tpu.dot_dimension_numbers<[1], [0], [0], [1], [0, 0, 1, 1], [], []>} : vector<2x64xbf16>, vector<64x16xbf16>, vector<2x16xf32> -> vector<2x16xf32>
    %c0_20 = arith.constant 0 : index
    %c0_21 = arith.constant 0 : index
    %29 = vector.load %arg8[%c0_20, %c0_21] : memref<1x16xf32, #tpu.memory_space<vmem>>, vector<1x16xf32>
    %30 = vector.broadcast %29 : vector<1x16xf32> to vector<2x16xf32>
    %31 = arith.addf %28, %30 : vector<2x16xf32>
    %32 = arith.truncf %31 : vector<2x16xf32> to vector<2x16xbf16>
    %c0_22 = arith.constant 0 : index
    %c0_23 = arith.constant 0 : index
    %33 = vector.load %arg9[%c0_22, %c0_23] : memref<16x64xbf16, #tpu.memory_space<vmem>>, vector<16x64xbf16>
    %cst_24 = arith.constant dense<0.000000e+00> : vector<2x64xf32>
    %34 = tpu.matmul %32, %33, %cst_24 {dimension_numbers = #tpu.dot_dimension_numbers<[1], [0], [0], [1], [0, 0, 1, 1], [], []>} : vector<2x16xbf16>, vector<16x64xbf16>, vector<2x64xf32> -> vector<2x64xf32>
    %c0_25 = arith.constant 0 : index
    %c0_26 = arith.constant 0 : index
    %35 = vector.load %arg10[%c0_25, %c0_26] : memref<1x64xf32, #tpu.memory_space<vmem>>, vector<1x64xf32>
    %36 = vector.broadcast %35 : vector<1x64xf32> to vector<2x64xf32>
    %37 = arith.addf %34, %36 : vector<2x64xf32>
    %cst_27 = arith.constant 0.000000e+00 : f32
    %38 = vector.broadcast %cst_27 : f32 to vector<2x64xf32>
    %39 = arith.maximumf %37, %38 : vector<2x64xf32>
    %40 = arith.truncf %39 : vector<2x64xf32> to vector<2x64xbf16>
    %c0_28 = arith.constant 0 : index
    %c0_29 = arith.constant 0 : index
    %41 = vector.load %arg11[%c0_28, %c0_29] : memref<64x64xbf16, #tpu.memory_space<vmem>>, vector<64x64xbf16>
    %cst_30 = arith.constant dense<0.000000e+00> : vector<2x64xf32>
    %42 = tpu.matmul %40, %41, %cst_30 {dimension_numbers = #tpu.dot_dimension_numbers<[1], [0], [0], [1], [0, 0, 1, 1], [], []>} : vector<2x64xbf16>, vector<64x64xbf16>, vector<2x64xf32> -> vector<2x64xf32>
    %c0_31 = arith.constant 0 : index
    %c0_32 = arith.constant 0 : index
    %43 = vector.load %arg12[%c0_31, %c0_32] : memref<1x64xf32, #tpu.memory_space<vmem>>, vector<1x64xf32>
    %44 = vector.broadcast %43 : vector<1x64xf32> to vector<2x64xf32>
    %45 = arith.addf %42, %44 : vector<2x64xf32>
    %cst_33 = arith.constant 0.000000e+00 : f32
    %46 = vector.broadcast %cst_33 : f32 to vector<2x64xf32>
    %47 = arith.maximumf %45, %46 : vector<2x64xf32>
    %48 = arith.truncf %47 : vector<2x64xf32> to vector<2x64xbf16>
    %c0_34 = arith.constant 0 : index
    %c0_35 = arith.constant 0 : index
    %49 = vector.load %arg13[%c0_34, %c0_35] : memref<2x64xbf16, #tpu.memory_space<vmem>>, vector<2x64xbf16>
    tpu.vector_store %arg13[%c0_34, %c0_35], %48 {strides = array<i32>} : memref<2x64xbf16, #tpu.memory_space<vmem>>, vector<2x64xbf16>,
    return
  }
}

</mosaic_0001>

<bundles_post_ra>
// kernel: _forward.3
= control target key start
LH: loop header
LB: loop body
LE: loop exit
PB: predicated region body
PF: predicated region fallthrough
CT: control target
= control target key end

     0   :  { %8 = vsyncpa [#allocation4], 0  ;;  %s701_s0 = inlined_call_operand.vmem [shape: bf16[2,64], index: 0, kind: input, shape index: {}]   ;;  %s702_s1 = inlined_call_operand.vmem [shape: bf16[64,512], index: 1, kind: input, shape index: {}]   ;;  %s703_s2 = inlined_call_operand.vmem [shape: f32[1,512], index: 2, kind: input, shape index: {}]   ;;  %s704_s3 = inlined_call_operand.hbm [shape: bf16[2,512], index: 3, kind: output, shape index: {}]  }
   0x1   :  { %10 = vsyncpa [#allocation4 + $0x1], 0  ;;  %s586_s12 = smov 0   ;;  %s588_s13 = smov 0  }
   0x2   :  { %s590_s14 = smov 0   ;;  %s592_s15 = smov 0  }
   0x3 LB: > { %s607_s16 = sadd.s32 4294967295, %s561_s15   ;;  %s421_s17 = sadd.s32 4294967294, %s561_s15   ;;  %s561_s15 = sphi %s592_s15, %s710_s15   ;;  %s557_s14 = sphi %s590_s14, %s709_s14   ;;  %s553_s13 = sphi %s588_s13, %s708_s13   ;;  %s549_s12 = sphi %s586_s12, %s707_s12  }
   0x4   : > { %s611_s18 = sadd.s32 1, %s561_s15   ;;  %s44_s19 = sadd.s32 1, %s557_s14 }
   0x5   : > { %s41_s20 = ssub.s32 %s561_s15, %s611_s18  ;;  %p51_p0 = scmp.ne.s32.totalorder %s557_s14, %s553_s13 }
   0x6   : > { %p42_p1 = scmp.eq.s32.totalorder %s41_s20, 0  ;;  %p52_p2 = scmp.eq.s32.totalorder %s561_s15, 0 }
   0x7   : > { %p107_p3 = scmp.eq.s32.totalorder %s607_s16, 3  ;;  %p112_p4 = scmp.ne.s32.totalorder %s553_s13, %s549_s12 }
   0x8   : > { %s623_s21 = scalar_select %p42_p1, %s557_s14, %s44_s19  }
   0x9   : > { %p53_p5 = por %p52_p2, %p51_p0  ;;  %p625_p6 = por %p107_p3, %p51_p0 }
   0xa   : > { %p113_p7 = scmp.eq.s32.totalorder %s421_s17, 3  ;;  %p423_p9 = scmp.ge.s32.totalorder %s561_s15, 4 }
   0xc   : > { %p629_p8 = por %p113_p7, %p112_p4  ;;  %132 = sbr.rel (%p423_p9) target bundleno = 28 (0x1c), region = 20 }
  0x13   : > { %135 = sbr.rel (!%p53_p5) target bundleno = 28 (0x1c), region = 24  ;;  %s137_s24 = sand.u32 (%p53_p5), 1, %s557_s14  }
  0x14   : > { %s425_s25 = sshll.u32 (%p53_p5), %s561_s15, 2  ;;  %s424_s26 = sshll.u32 (%p53_p5), %s137_s24, 5 }
  0x15   : > { %s141_s29 = scalar_lea.vmem (%p53_p5), %s702_s1, %s425_s25  ;;  %s139_s30 = scalar_lea.vmem (%p53_p5), [#allocation2], %s424_s26 }
  0x16   : > { %v157_v0 = vld [vmem:[%s141_s29] sm:$0xf] (%p53_p5)  ;;  %v159_v1 = vld [vmem:[%s141_s29 + $0x10] sm:$0xf] (%p53_p5) }
  0x17   : > { %158 = vst [vmem:[%s139_s30] sm:$0xf] (%p53_p5), %v157_v0  ;;  %160 = vst [vmem:[%s139_s30 + $0x4] sm:$0xf] (%p53_p5), %v159_v1  ;;  %v161_v2 = vld [vmem:[%s141_s29 + $0x20] sm:$0xf] (%p53_p5) }
  0x18   : > { %v163_v3 = vld [vmem:[%s141_s29 + $0x30] sm:$0xf] (%p53_p5)  ;;  %v165_v4 = vld [vmem:[%s141_s29 + $0x40] sm:$0xf] (%p53_p5)  ;;  %162 = vst [vmem:[%s139_s30 + $0x8] sm:$0xf] (%p53_p5), %v161_v2 }
  0x19   : > { %164 = vst [vmem:[%s139_s30 + $0xc] sm:$0xf] (%p53_p5), %v163_v3  ;;  %166 = vst [vmem:[%s139_s30 + $0x10] sm:$0xf] (%p53_p5), %v165_v4  ;;  %v167_v5 = vld [vmem:[%s141_s29 + $0x50] sm:$0xf] (%p53_p5) }
  0x1a   : > { %v169_v6 = vld [vmem:[%s141_s29 + $0x60] sm:$0xf]  ;;  %v171_v7 = vld [vmem:[%s141_s29 + $0x70] sm:$0xf]  ;;  %168 = vst [vmem:[%s139_s30 + $0x14] sm:$0xf] %v167_v5 }
  0x1b   : > { %170 = vst [vmem:[%s139_s30 + $0x18] sm:$0xf] %v169_v6  ;;  %172 = vst [vmem:[%s139_s30 + $0x1c] sm:$0xf] %v171_v7 }
  0x1c PF: > { %p426_p10 = scmp.ge.s32.totalorder %s561_s15, 1  ;;  %p216_p11 = scmp.lt.s32.totalorder %s561_s15, 5 }
  0x1e   : > { %p217_p12 = pnand %p426_p10, %p216_p11 }
  0x1f   : > { %s642_s4 = sand.u32 (!%p217_p12), 1, %s553_s13   ;;  %v563_v8 = vmov (!%p217_p12), 0.0   ;;  %vm564_vm0 = vmmov (!%p217_p12), 0   ;;  %v252_v13 = vld [vmem:[%s701_s0] sm:$0x1] (!%p217_p12)  ;;  %vm292_vm1 = vcmask (!%p217_p12), 523264  }
  0x20   : > { %220 = sbr.rel (%p217_p12) target bundleno = 280 (0x118), region = 69  ;;  %442 = vmatprep.subr.bf16.mxu0 (!%p217_p12), %v563_v8  ;;  %s427_s5 = sshll.u32 (!%p217_p12), %s642_s4, 5  ;;  %450 = vmatprep.mubr.msk.bf16.mxu0 (!%p217_p12), %vm564_vm0, %v563_v8 }
  0x21   : > { %s225_s6 = scalar_lea.vmem (!%p217_p12), [#allocation2], %s427_s5  ;;  %p248_p13 = scmp.lt.s32.totalorder (!%p217_p12), %s607_s16, 3 }
  0x22   : > { %v495_v9 = vld [vmem:[%s225_s6] sm:$0xff] (!%p217_p12)   ;;  %v496_v10 = vld [vmem:[%s225_s6 + $0x8] sm:$0xff] (!%p217_p12)   ;;  %v497_v11 = vld [vmem:[%s225_s6 + $0x10] sm:$0xff] (!%p217_p12)   ;;  %s434_s19 = sshll.u32 (!%p217_p12), %s607_s16, 4  ;;  %s247_s20 = scalar_lea.vmem (!%p217_p12), [#allocation3], %s642_s4 }
  0x23   : > { %443 = vmatpush3.bf16.msra.mxu0 (!%p217_p12), %v495_v9  ;;  %v498_v12 = vld [vmem:[%s225_s6 + $0x18] sm:$0xff] (!%p217_p12)   ;;  %s351_s24 = sshll.u32 (!%p217_p12), %s247_s20, 4  ;;  %s658_s27 = scalar_lea.hbm (!%p217_p12), %s704_s3, %s434_s19  ;;  %s660_s24 = int_to_ptr.vmem [resolvable:$true] %s351_s24 }
  0x24   : > { %444 = vmatprep.subr.bf16.mxu0 (!%p217_p12), %v563_v8  ;;  %s339_s28 = scalar_lea.sflag (!%p217_p12), [#allocation4], %s642_s4  ;;  %s565_s29 = smov (!%p217_p12), [#allocation3]  }
  0x25   : > { %s503_s30 = sshll.u32 (!%p217_p12), %s565_s29, 4  ;;  %s504_s30 = int_to_ptr.vmem [resolvable:$false] %s503_s30 }
  0x26   : > { %s505_s5 = scalar_lea.vmem (!%p217_p12), %s504_s30, 32  ;;  %p506_p3 = scmp.lt.s32.totalorder (!%p217_p12), %s660_s24, %s504_s30 }
  0x27   : > { %445 = vmatpush3.bf16.msra.mxu0 %v496_v10  ;;  %s249_s9 = scalar_select %p248_p13, %s607_s16, 3 }
  0x28   : > { %446 = vmatprep.subr.bf16.mxu0 %v563_v8  ;;  %s499_s16 = scalar_lea.vmem %s660_s24, 16 }
  0x29   : > { %s250_s17 = scalar_lea.vmem %s703_s2, %s249_s9  ;;  %p500_p0 = scmp.ne.s32.totalorder %s660_s24, %s499_s16 }
  0x2a   : > { %v428_v14 = vld [vmem:[%s250_s17] ss:$0 sm:$0xff]  ;;  %p507_p4 = scmp.lt.s32.totalorder %s505_s5, %s499_s16 }
  0x2b   : > { %447 = vmatpush3.bf16.msra.mxu0 %v497_v11  ;;  %p501_p1 = pnand %p500_p0, %p625_p6 }
  0x2c   : > { %448 = vmatprep.subr.bf16.mxu0 %v563_v8  ;;  %p508_p5 = por %p507_p4, %p506_p3 }
  0x2d   : > { %p502_p2 = pneg %p501_p1 }
  0x2f   : > { %449 = vmatpush3.bf16.msra.mxu0 %v498_v12  ;;  %p509_p7 = pnand %p508_p5, %p502_p2 }
  0x32   : > { %451 = vmatmul.mubr.msk.bf16.vlgmr.msra.gmra.mrb[0].mxu0 %vm292_vm1, %v252_v13 }
 0x105   : > { %v330_v15 = vpop.f32.mrb[0].mxu0 }
 0x106   : > { %v331_v16 = vadd.f32 %v428_v14, %v330_v15  ;;  %v452_v17 = vpop.f32.mrb[1].mxu0 }
 0x107   : > { %v333_v18 = vpop.f32.mrb[2].mxu0 }
 0x108   : > { %v336_v19 = vpack.c.bf16 %v331_v16, %v331_v16  ;;  %v453_v20 = vpop.f32.mrb[3].mxu0 }
 0x10a   : > { %337 = vst [vmem:[%s247_s20] sm:$0x1] %v336_v19 }
 0x10b   : > { %512 = shalt.err (!%p509_p7)
}
 0x10c   : > { %s513_s4 = scalar_lea.hbm %s658_s27, 16  ;;  %s517_s8 = scalar_lea.hbm %s704_s3, 64 }
 0x10d   : > { %p514_p9 = scmp.ne.s32.totalorder %s658_s27, %s513_s4  ;;  %p518_p12 = scmp.lt.u32.totalorder %s658_s27, %s704_s3 }
 0x10e   : > { %p519_p13 = scmp.lt.u32.totalorder %s517_s8, %s513_s4  ;;  %p521_p1 = scmp.lt.u32.totalorder %s513_s4, %s658_s27 }
 0x10f   : > { %p515_p10 = pnand %p514_p9, %p625_p6 }
 0x110   : > { %p520_p0 = por %p519_p13, %p518_p12 }
 0x111   : > { %p516_p11 = pneg %p515_p10 }
 0x112   : > { %p522_p2 = por %p521_p1, %p520_p0 }
 0x114   : > { %p523_p3 = pnand %p522_p2, %p516_p11 }
 0x116   : > { %526 = shalt.err (!%p523_p3)
}
 0x117   : > { %454 = dma.vmem_to_hbm [thread:$0]  (%p625_p6), %s660_s24, 16, %s658_s27, %s339_s28  }
 0x118 PF: > { %p460_p4 = scmp.ge.s32.totalorder %s561_s15, 2  ;;  %s363_s11 = sand.u32 1, %s549_s12  }
 0x119   : > { %s364_s17 = scalar_lea.sflag [#allocation4], %s363_s11 }
 0x11a   : > { %p457_p5 = pnand %p460_p4, %p629_p8 }
 0x11c   : > { %544 = dma.done.wait (!%p457_p5), %s364_s17, 16  }
 0x11d   : > { %546 = vsyncadd (!%p457_p5), %s364_s17, 4294967280  ;;  %p13_p7 = scmp.ge.s32.totalorder %s611_s18, 6   ;;  %s707_s12 = smov %s553_s13 }
 0x11e   : > { %s708_s13 = smov %s557_s14  ;;  %s709_s14 = smov %s623_s21 }
 0x11f   : > { %s710_s15 = smov %s611_s18  ;;  %15 = sbr.rel (!%p13_p7) target bundleno = 3 (0x3), region = 116 }
 0x126   :  { %368 = vsyncpa [#allocation4], 1 }
 0x127   :  { %370 = vsyncpa [#allocation4 + $0x1], 1 }

// kernel: _forward.2
= control target key start
LH: loop header
LB: loop body
LE: loop exit
PB: predicated region body
PF: predicated region fallthrough
CT: control target
= control target key end

     0   :  { %v1101_v0 = vmov 0   ;;  %v1102_v26 = vmov 0.0   ;;  %vm1103_vm0 = vmmov 0   ;;  %vm425_vm1 = vcmask 1041409   ;;  %s1436_s1 = inlined_call_operand.vmem [shape: f32[192,1], index: 1, kind: input, shape index: {}]   ;;  %s1437_s3 = inlined_call_operand.vmem [shape: bf16[128,64], index: 3, kind: input, shape index: {}]   ;;  %s1438_s5 = inlined_call_operand.vmem [shape: bf16[64,64], index: 5, kind: input, shape index: {}]   ;;  %s1439_s0 = inlined_call_operand.vmem [shape: bf16[2,192,128], index: 0, kind: input, shape index: {}]   ;;  %s1440_s2 = inlined_call_operand.<no memory space> [shape: f32[1], index: 2, kind: input, shape index: {}]   ;;  %s1441_s7 = inlined_call_operand.vmem [shape: bf16[64,16], index: 7, kind: input, shape index: {}]   ;;  %s1442_s4 = inlined_call_operand.vmem [shape: f32[1,64], index: 4, kind: input, shape index: {}]   ;;  %s1443_s9 = inlined_call_operand.vmem [shape: bf16[16,64], index: 9, kind: input, shape index: {}]   ;;  %s1444_s6 = inlined_call_operand.vmem [shape: f32[1,64], index: 6, kind: input, shape index: {}]   ;;  %s1445_s11 = inlined_call_operand.vmem [shape: bf16[64,64], index: 11, kind: input, shape index: {}]   ;;  %s1446_s8 = inlined_call_operand.vmem [shape: f32[1,16], index: 8, kind: input, shape index: {}]   ;;  %s1447_s10 = inlined_call_operand.vmem [shape: f32[1,64], index: 10, kind: input, shape index: {}]   ;;  %s1448_s12 = inlined_call_operand.vmem [shape: f32[1,64], index: 12, kind: input, shape index: {}]   ;;  %s1449_s13 = inlined_call_operand.vmem [shape: bf16[2,64], index: 13, kind: output, shape index: {}]  }
   0x1   :  { %1079 = vset.pattern.permute.xlu1 %v1101_v0  ;;  %1078 = vset.pattern.permute.xlu0 %v1101_v0  ;;  %v144_v1 = vld [vmem:[%s1436_s1 + $0x10] sm:$0xff]  ;;  %v142_v2 = vld [vmem:[%s1436_s1] sm:$0xff]  ;;  %v145_v3 = vld [vmem:[%s1436_s1 + $0x18] sm:$0xff]  ;;  %vm558_vm2 = vcmask 523264   ;;  %vm702_vm3 = vcmask 130048   ;;  %vm832_vm4 = vcmask 516096  }
   0x2   :  { %178 = vperm.xlu1 %1079, %v144_v1   ;;  %168 = vperm.xlu0 %1078, %v142_v2   ;;  %v143_v4 = vld [vmem:[%s1436_s1 + $0x8] sm:$0xff]  ;;  %v146_v6 = vld [vmem:[%s1436_s1 + $0x20] sm:$0xff]  ;;  %v149_v7 = vld [vmem:[%s1436_s1 + $0x38] sm:$0xff] }
   0x3   :  { %v147_v5 = vld [vmem:[%s1436_s1 + $0x28] sm:$0xff]  ;;  %v148_v8 = vld [vmem:[%s1436_s1 + $0x30] sm:$0xff]  ;;  %v150_v10 = vld [vmem:[%s1436_s1 + $0x40] sm:$0xff]  ;;  %1013 = vmatprep.subr.bf16.mxu0 %v1102_v26  ;;  %1033 = vmatprep.subr.bf16.mxu1 %v1102_v26 }
   0x4   :  { %v151_v9 = vld [vmem:[%s1436_s1 + $0x48] sm:$0xff]  ;;  %v153_v11 = vld [vmem:[%s1436_s1 + $0x58] sm:$0xff]  ;;  %v152_v12 = vld [vmem:[%s1436_s1 + $0x50] sm:$0xff]  ;;  %1029 = vmatprep.mubr.msk.bf16.mxu0 %vm1103_vm0, %v1102_v26  ;;  %1041 = vmatprep.mubr.msk.bf16.mxu1 %vm1103_vm0, %v1102_v26 }
   0x5   :  { %v155_v13 = vld [vmem:[%s1436_s1 + $0x68] sm:$0xff]  ;;  %v154_v14 = vld [vmem:[%s1436_s1 + $0x60] sm:$0xff]  ;;  %v157_v15 = vld [vmem:[%s1436_s1 + $0x78] sm:$0xff] }
   0x6   :  { %183 = vperm.xlu1 %1079, %v145_v3   ;;  %173 = vperm.xlu0 %1078, %v143_v4   ;;  %v156_v16 = vld [vmem:[%s1436_s1 + $0x70] sm:$0xff]  ;;  %v159_v17 = vld [vmem:[%s1436_s1 + $0x88] sm:$0xff]  ;;  %v158_v18 = vld [vmem:[%s1436_s1 + $0x80] sm:$0xff] }
   0x7   :  { %v161_v19 = vld [vmem:[%s1436_s1 + $0x98] sm:$0xff]  ;;  %v160_v20 = vld [vmem:[%s1436_s1 + $0x90] sm:$0xff]  ;;  %v163_v21 = vld [vmem:[%s1436_s1 + $0xa8] sm:$0xff] }
   0x8   :  { %v162_v22 = vld [vmem:[%s1436_s1 + $0xa0] sm:$0xff]  ;;  %v165_v23 = vld [vmem:[%s1436_s1 + $0xb8] sm:$0xff]  ;;  %v164_v24 = vld [vmem:[%s1436_s1 + $0xb0] sm:$0xff] }
   0x9   :  { %v1080_v25 = vld [vmem:[%s1437_s3] sm:$0xff]   ;;  %v1081_v27 = vld [vmem:[%s1437_s3 + $0x8] sm:$0xff]   ;;  %v1082_v28 = vld [vmem:[%s1437_s3 + $0x10] sm:$0xff]  }
   0xa   :  { %193 = vperm.xlu1 %1079, %v147_v5   ;;  %188 = vperm.xlu0 %1078, %v146_v6   ;;  %v1083_v29 = vld [vmem:[%s1437_s3 + $0x18] sm:$0xff]   ;;  %v1084_v30 = vld [vmem:[%s1437_s3 + $0x20] sm:$0xff]   ;;  %v1085_v31 = vld [vmem:[%s1437_s3 + $0x28] sm:$0xff]  }
   0xb   :  { %1014 = vmatpush3.bf16.msra.mxu0 %v1080_v25  ;;  %v1086_v32 = vld [vmem:[%s1437_s3 + $0x30] sm:$0xff]   ;;  %v1087_v33 = vld [vmem:[%s1437_s3 + $0x38] sm:$0xff]   ;;  %v1088_v34 = vld [vmem:[%s1438_s5] sm:$0xff]  }
   0xc   :  { %1015 = vmatprep.subr.bf16.mxu0 %v1102_v26  ;;  %1034 = vmatpush3.bf16.msra.mxu1 %v1088_v34  ;;  %v1089_v35 = vld [vmem:[%s1438_s5 + $0x8] sm:$0xff]   ;;  %v869_v36 = vld [vmem:[%s1439_s0] sm:$0xff]   ;;  %v965_v48 = vld [vmem:[%s1439_s0 + $0x10] sm:$0xff]  }
   0xd   :  { %1035 = vmatprep.subr.bf16.mxu1 %v1102_v26  ;;  %v975_v37 = vld [vmem:[%s1439_s0 + $0x60] sm:$0xff]   ;;  %v964_v39 = vld [vmem:[%s1439_s0 + $0x8] sm:$0xff]   ;;  %v870_v42 = vunpack.c.l.bf16 %v869_v36  ;;  %v871_v44 = vunpack.c.h.bf16 %v869_v36  ;;  %v977_v49 = vld [vmem:[%s1439_s0 + $0x70] sm:$0xff]   ;;  %v878_v58 = vunpack.c.l.bf16 %v965_v48  ;;  %v879_v3 = vunpack.c.h.bf16 %v965_v48 }
   0xe   :  { %203 = vperm.xlu1 %1079, %v149_v7   ;;  %198 = vperm.xlu0 %1078, %v148_v8   ;;  %v976_v40 = vld [vmem:[%s1439_s0 + $0x68] sm:$0xff]   ;;  %v918_v43 = vunpack.c.l.bf16 %v975_v37  ;;  %v919_v45 = vunpack.c.h.bf16 %v975_v37  ;;  %v874_v46 = vunpack.c.l.bf16 %v964_v39  ;;  %v875_v51 = vunpack.c.h.bf16 %v964_v39  ;;  %v966_v0 = vld [vmem:[%s1439_s0 + $0x18] sm:$0xff]  }
   0xf   :  { %1016 = vmatpush3.bf16.msra.mxu0 %v1081_v27  ;;  %v922_v47 = vunpack.c.l.bf16 %v976_v40  ;;  %v923_v52 = vunpack.c.h.bf16 %v976_v40  ;;  %v926_v59 = vunpack.c.l.bf16 %v977_v49  ;;  %v978_v1 = vld [vmem:[%s1439_s0 + $0x78] sm:$0xff]   ;;  %v927_v4 = vunpack.c.h.bf16 %v977_v49  ;;  %v980_v34 = vld [vmem:[%s1439_s0 + $0x88] sm:$0xff]   ;;  %v969_v49 = vld [vmem:[%s1439_s0 + $0x30] sm:$0xff]  }
  0x10   :  { %1017 = vmatprep.subr.bf16.mxu0 %v1102_v26  ;;  %1036 = vmatpush3.bf16.msra.mxu1 %v1089_v35 }
  0x11   :  { %1037 = vmatprep.subr.bf16.mxu1 %v1102_v26 }
  0x12   :  { %213 = vperm.xlu1 %1079, %v151_v9   ;;  %208 = vperm.xlu0 %1078, %v150_v10   ;;  %v882_v10 = vunpack.c.l.bf16 %v966_v0 }
  0x13   :  { %1018 = vmatpush3.bf16.msra.mxu0 %v1082_v28 }
  0x14   :  { %1019 = vmatprep.subr.bf16.mxu0 %v1102_v26 }
  0x16   :  { %223 = vperm.xlu1 %1079, %v153_v11   ;;  %218 = vperm.xlu0 %1078, %v152_v12   ;;  %v930_v11 = vunpack.c.l.bf16 %v978_v1 }
  0x17   :  { %1020 = vmatpush3.bf16.msra.mxu0 %v1083_v29 }
  0x18   :  { %1021 = vmatprep.subr.bf16.mxu0 %v1102_v26 }
  0x1a   :  { %233 = vperm.xlu1 %1079, %v155_v13   ;;  %228 = vperm.xlu0 %1078, %v154_v14  }
  0x1b   :  { %1022 = vmatpush3.bf16.msra.mxu0 %v1084_v30 }
  0x1c   :  { %1023 = vmatprep.subr.bf16.mxu0 %v1102_v26 }
  0x1e   :  { %243 = vperm.xlu1 %1079, %v157_v15   ;;  %238 = vperm.xlu0 %1078, %v156_v16   ;;  %v967_v16 = vld [vmem:[%s1439_s0 + $0x20] sm:$0xff]  }
  0x1f   :  { %1024 = vmatpush3.bf16.msra.mxu0 %v1085_v31  ;;  %v886_v27 = vunpack.c.l.bf16 %v967_v16  ;;  %v887_v36 = vunpack.c.h.bf16 %v967_v16 }
  0x20   :  { %1025 = vmatprep.subr.bf16.mxu0 %v1102_v26 }
  0x22   :  { %253 = vperm.xlu1 %1079, %v159_v17   ;;  %248 = vperm.xlu0 %1078, %v158_v18   ;;  %v979_v17 = vld [vmem:[%s1439_s0 + $0x80] sm:$0xff]  }
  0x23   :  { %1026 = vmatpush3.bf16.msra.mxu0 %v1086_v32  ;;  %v934_v28 = vunpack.c.l.bf16 %v979_v17  ;;  %v935_v37 = vunpack.c.h.bf16 %v979_v17  ;;  %v971_v17 = vld [vmem:[%s1439_s0 + $0x40] sm:$0xff]  }
  0x24   :  { %1027 = vmatprep.subr.bf16.mxu0 %v1102_v26 }
  0x26   :  { %263 = vperm.xlu1 %1079, %v161_v19   ;;  %258 = vperm.xlu0 %1078, %v160_v20   ;;  %v883_v19 = vunpack.c.h.bf16 %v966_v0  ;;  %v931_v20 = vunpack.c.h.bf16 %v978_v1  ;;  %v970_v1 = vld [vmem:[%s1439_s0 + $0x38] sm:$0xff]  }
  0x27   :  { %1028 = vmatpush3.bf16.msra.mxu0 %v1087_v33  ;;  %v968_v33 = vld [vmem:[%s1439_s0 + $0x28] sm:$0xff]  }
  0x28   :  { %1057 = vmatprep.subr.bf16.mxu0 %v1102_v26 }
  0x2a   :  { %273 = vperm.xlu1 %1079, %v163_v21   ;;  %268 = vperm.xlu0 %1078, %v162_v22  }
  0x2e   :  { %283 = vperm.xlu1 %1079, %v165_v23   ;;  %278 = vperm.xlu0 %1078, %v164_v24  }
  0x81   :  { %v179_v38 = vpop.permute.xlu1 %178  ;;  %v169_v41 = vpop.permute.xlu0 %168 }
  0x82   :  { %v286_v54 = vmul.f32 %v870_v42, %v169_v41  ;;  %v310_v55 = vmul.f32 %v918_v43, %v169_v41  ;;  %v288_v60 = vmul.f32 %v874_v46, %v179_v38  ;;  %v312_v61 = vmul.f32 %v922_v47, %v179_v38 }
  0x83   :  { %v890_v43 = vunpack.c.l.bf16 %v968_v33 }
  0x85   :  { %v184_v50 = vpop.permute.xlu1 %183  ;;  %v174_v53 = vpop.permute.xlu0 %173 }
  0x86   :  { %v287_v56 = vmul.f32 %v871_v44, %v174_v53  ;;  %v311_v57 = vmul.f32 %v919_v45, %v174_v53  ;;  %v289_v6 = vmul.f32 %v875_v51, %v184_v50  ;;  %v313_v7 = vmul.f32 %v923_v52, %v184_v50  ;;  %v981_v50 = vld [vmem:[%s1439_s0 + $0x90] sm:$0xff]  }
  0x87   :  { %v938_v44 = vunpack.c.l.bf16 %v980_v34  ;;  %v891_v52 = vunpack.c.h.bf16 %v968_v33  ;;  %v939_v53 = vunpack.c.h.bf16 %v980_v34  ;;  %v972_v34 = vld [vmem:[%s1439_s0 + $0x48] sm:$0xff]  }
  0x88   :  { %v334_v62 = vadd.f32 %v287_v56, %v286_v54  ;;  %v363_v63 = vadd.f32 %v311_v57, %v310_v55 }
  0x89   :  { %v194_v2 = vpop.permute.xlu1 %193  ;;  %v189_v5 = vpop.permute.xlu0 %188 }
  0x8a   :  { %v335_v8 = vadd.f32 %v334_v62, %v288_v60  ;;  %v364_v9 = vadd.f32 %v363_v63, %v312_v61  ;;  %v290_v12 = vmul.f32 %v878_v58, %v189_v5  ;;  %v314_v13 = vmul.f32 %v926_v59, %v189_v5 }
  0x8b   :  { %v291_v22 = vmul.f32 %v879_v3, %v194_v2  ;;  %v315_v23 = vmul.f32 %v927_v4, %v194_v2  ;;  %v894_v59 = vunpack.c.l.bf16 %v969_v49  ;;  %v942_v60 = vunpack.c.l.bf16 %v981_v50  ;;  %v982_v2 = vld [vmem:[%s1439_s0 + $0x98] sm:$0xff]  }
  0x8c   :  { %v336_v14 = vadd.f32 %v335_v8, %v289_v6  ;;  %v365_v15 = vadd.f32 %v364_v9, %v313_v7  ;;  %v895_v4 = vunpack.c.h.bf16 %v969_v49  ;;  %v943_v5 = vunpack.c.h.bf16 %v981_v50  ;;  %v973_v50 = vld [vmem:[%s1439_s0 + $0x50] sm:$0xff]  }
  0x8d   :  { %v204_v18 = vpop.permute.xlu1 %203  ;;  %v199_v21 = vpop.permute.xlu0 %198 }
  0x8e   :  { %v337_v24 = vadd.f32 %v336_v14, %v290_v12  ;;  %v366_v25 = vadd.f32 %v365_v15, %v314_v13  ;;  %v292_v29 = vmul.f32 %v882_v10, %v199_v21  ;;  %v316_v30 = vmul.f32 %v930_v11, %v199_v21 }
  0x8f   :  { %v293_v39 = vmul.f32 %v883_v19, %v204_v18  ;;  %v317_v40 = vmul.f32 %v931_v20, %v204_v18  ;;  %v898_v11 = vunpack.c.l.bf16 %v970_v1  ;;  %v946_v12 = vunpack.c.l.bf16 %v982_v2  ;;  %v983_v18 = vld [vmem:[%s1439_s0 + $0xa0] sm:$0xff]  }
  0x90   :  { %v338_v31 = vadd.f32 %v337_v24, %v291_v22  ;;  %v367_v32 = vadd.f32 %v366_v25, %v315_v23  ;;  %v899_v20 = vunpack.c.h.bf16 %v970_v1  ;;  %v947_v21 = vunpack.c.h.bf16 %v982_v2  ;;  %v974_v2 = vld [vmem:[%s1439_s0 + $0x58] sm:$0xff]  }
  0x91   :  { %v214_v35 = vpop.permute.xlu1 %213  ;;  %v209_v38 = vpop.permute.xlu0 %208 }
  0x92   :  { %v339_v41 = vadd.f32 %v338_v31, %v292_v29  ;;  %v368_v42 = vadd.f32 %v367_v32, %v316_v30  ;;  %v294_v45 = vmul.f32 %v886_v27, %v209_v38  ;;  %v318_v46 = vmul.f32 %v934_v28, %v209_v38 }
  0x93   :  { %v295_v55 = vmul.f32 %v887_v36, %v214_v35  ;;  %v319_v56 = vmul.f32 %v935_v37, %v214_v35  ;;  %v902_v28 = vunpack.c.l.bf16 %v971_v17  ;;  %v950_v29 = vunpack.c.l.bf16 %v983_v18  ;;  %v984_v35 = vld [vmem:[%s1439_s0 + $0xa8] sm:$0xff]  }
  0x94   :  { %v340_v47 = vadd.f32 %v339_v41, %v293_v39  ;;  %v369_v48 = vadd.f32 %v368_v42, %v317_v40  ;;  %v903_v37 = vunpack.c.h.bf16 %v971_v17  ;;  %v951_v38 = vunpack.c.h.bf16 %v983_v18 }
  0x95   :  { %v224_v51 = vpop.permute.xlu1 %223  ;;  %v219_v54 = vpop.permute.xlu0 %218  ;;  %v915_v18 = vunpack.c.h.bf16 %v974_v2 }
  0x96   :  { %v341_v57 = vadd.f32 %v340_v47, %v294_v45  ;;  %v370_v58 = vadd.f32 %v369_v48, %v318_v46  ;;  %v296_v61 = vmul.f32 %v890_v43, %v219_v54  ;;  %v320_v62 = vmul.f32 %v938_v44, %v219_v54 }
  0x97   :  { %v297_v7 = vmul.f32 %v891_v52, %v224_v51  ;;  %v321_v8 = vmul.f32 %v939_v53, %v224_v51  ;;  %v906_v44 = vunpack.c.l.bf16 %v972_v34  ;;  %v954_v45 = vunpack.c.l.bf16 %v984_v35  ;;  %v985_v51 = vld [vmem:[%s1439_s0 + $0xb0] sm:$0xff]  }
  0x98   :  { %v342_v63 = vadd.f32 %v341_v57, %v295_v55  ;;  %v371_v0 = vadd.f32 %v370_v58, %v319_v56  ;;  %v907_v53 = vunpack.c.h.bf16 %v972_v34  ;;  %v955_v54 = vunpack.c.h.bf16 %v984_v35 }
  0x99   :  { %v234_v3 = vpop.permute.xlu1 %233  ;;  %v229_v6 = vpop.permute.xlu0 %228 }
  0x9a   :  { %v343_v9 = vadd.f32 %v342_v63, %v296_v61  ;;  %v372_v10 = vadd.f32 %v371_v0, %v320_v62  ;;  %v298_v13 = vmul.f32 %v894_v59, %v229_v6  ;;  %v322_v14 = vmul.f32 %v942_v60, %v229_v6 }
  0x9b   :  { %v299_v23 = vmul.f32 %v895_v4, %v234_v3  ;;  %v323_v24 = vmul.f32 %v943_v5, %v234_v3  ;;  %v910_v60 = vunpack.c.l.bf16 %v973_v50  ;;  %v958_v61 = vunpack.c.l.bf16 %v985_v51  ;;  %v986_v3 = vld [vmem:[%s1439_s0 + $0xb8] sm:$0xff]  }
  0x9c   :  { %v344_v15 = vadd.f32 %v343_v9, %v297_v7  ;;  %v373_v16 = vadd.f32 %v372_v10, %v321_v8  ;;  %v911_v5 = vunpack.c.h.bf16 %v973_v50  ;;  %v959_v6 = vunpack.c.h.bf16 %v985_v51 }
  0x9d   :  { %v244_v19 = vpop.permute.xlu1 %243  ;;  %v239_v22 = vpop.permute.xlu0 %238 }
  0x9e   :  { %v345_v25 = vadd.f32 %v344_v15, %v298_v13  ;;  %v374_v27 = vadd.f32 %v373_v16, %v322_v14  ;;  %v300_v30 = vmul.f32 %v898_v11, %v239_v22  ;;  %v324_v31 = vmul.f32 %v946_v12, %v239_v22 }
  0x9f   :  { %v301_v40 = vmul.f32 %v899_v20, %v244_v19  ;;  %v325_v41 = vmul.f32 %v947_v21, %v244_v19  ;;  %v914_v12 = vunpack.c.l.bf16 %v974_v2  ;;  %v962_v13 = vunpack.c.l.bf16 %v986_v3 }
  0xa0   :  { %v346_v32 = vadd.f32 %v345_v25, %v299_v23  ;;  %v375_v33 = vadd.f32 %v374_v27, %v323_v24  ;;  %v963_v19 = vunpack.c.h.bf16 %v986_v3  ;;  %v1092_v3 = vld [vmem:[%s1441_s7] sm:$0xff]  }
  0xa1   :  { %v254_v36 = vpop.permute.xlu1 %253  ;;  %v249_v39 = vpop.permute.xlu0 %248 }
  0xa2   :  { %v347_v42 = vadd.f32 %v346_v32, %v300_v30  ;;  %v376_v43 = vadd.f32 %v375_v33, %v324_v31  ;;  %v302_v46 = vmul.f32 %v902_v28, %v249_v39  ;;  %v326_v47 = vmul.f32 %v950_v29, %v249_v39 }
  0xa3   :  { %v303_v56 = vmul.f32 %v903_v37, %v254_v36  ;;  %v327_v57 = vmul.f32 %v951_v38, %v254_v36 }
  0xa4   :  { %v348_v48 = vadd.f32 %v347_v42, %v301_v40  ;;  %v377_v49 = vadd.f32 %v376_v43, %v325_v41 }
  0xa5   :  { %v264_v52 = vpop.permute.xlu1 %263  ;;  %v259_v55 = vpop.permute.xlu0 %258 }
  0xa6   :  { %v349_v58 = vadd.f32 %v348_v48, %v302_v46  ;;  %v378_v59 = vadd.f32 %v377_v49, %v326_v47  ;;  %v304_v62 = vmul.f32 %v906_v44, %v259_v55  ;;  %v328_v63 = vmul.f32 %v954_v45, %v259_v55 }
  0xa7   :  { %v305_v8 = vmul.f32 %v907_v53, %v264_v52  ;;  %v329_v9 = vmul.f32 %v955_v54, %v264_v52  ;;  %v393_v47 = vstv %s1440_s2 }
  0xa8   :  { %v350_v0 = vadd.f32 %v349_v58, %v303_v56  ;;  %v379_v1 = vadd.f32 %v378_v59, %v327_v57  ;;  %v1090_v58 = vld [vmem:[%s1438_s5 + $0x10] sm:$0xff]   ;;  %v1091_v59 = vld [vmem:[%s1438_s5 + $0x18] sm:$0xff]  }
  0xa9   :  { %v274_v4 = vpop.permute.xlu1 %273  ;;  %v269_v7 = vpop.permute.xlu0 %268  ;;  %1038 = vmatpush3.bf16.msra.mxu1 %v1090_v58 }
  0xaa   :  { %v351_v10 = vadd.f32 %v350_v0, %v304_v62  ;;  %v380_v11 = vadd.f32 %v379_v1, %v328_v63  ;;  %v306_v14 = vmul.f32 %v910_v60, %v269_v7  ;;  %v330_v15 = vmul.f32 %v958_v61, %v269_v7  ;;  %1039 = vmatprep.subr.bf16.mxu1 %v1102_v26  ;;  %v838_v60 = vld [vmem:[%s1442_s4] ss:$0 sm:$0xff]  ;;  %v1095_v7 = vld [vmem:[%s1441_s7 + $0x18] sm:$0xff]  }
  0xab   :  { %v307_v21 = vmul.f32 %v911_v5, %v274_v4  ;;  %v331_v22 = vmul.f32 %v959_v6, %v274_v4  ;;  %v1093_v5 = vld [vmem:[%s1441_s7 + $0x8] sm:$0xff]   ;;  %v1094_v6 = vld [vmem:[%s1441_s7 + $0x10] sm:$0xff]  }
  0xac   :  { %v352_v16 = vadd.f32 %v351_v10, %v305_v8  ;;  %v381_v17 = vadd.f32 %v380_v11, %v329_v9  ;;  %v1096_v8 = vld [vmem:[%s1443_s9] sm:$0xff]  }
  0xad   :  { %v279_v20 = vpop.permute.xlu0 %278  ;;  %v284_v25 = vpop.permute.xlu1 %283  ;;  %1040 = vmatpush3.bf16.msra.mxu1 %v1091_v59  ;;  %v847_v9 = vld [vmem:[%s1444_s6] ss:$0 sm:$0xff] }
  0xae   :  { %v353_v23 = vadd.f32 %v352_v16, %v306_v14  ;;  %v382_v24 = vadd.f32 %v381_v17, %v330_v15  ;;  %v308_v27 = vmul.f32 %v914_v12, %v279_v20  ;;  %v332_v28 = vmul.f32 %v962_v13, %v279_v20  ;;  %1045 = vmatprep.subr.bf16.mxu1 %v1102_v26  ;;  %v1097_v17 = vld [vmem:[%s1445_s11] sm:$0xff]  }
  0xaf   :  { %v309_v31 = vmul.f32 %v915_v18, %v284_v25  ;;  %v333_v32 = vmul.f32 %v963_v19, %v284_v25  ;;  %v1098_v18 = vld [vmem:[%s1445_s11 + $0x8] sm:$0xff]   ;;  %v853_v19 = vld [vmem:[%s1446_s8] ss:$0 sm:$0xff] }
  0xb0   :  { %v354_v29 = vadd.f32 %v353_v23, %v307_v21  ;;  %v383_v30 = vadd.f32 %v382_v24, %v331_v22 }
  0xb2   :  { %v355_v33 = vadd.f32 %v354_v29, %v308_v27  ;;  %v384_v34 = vadd.f32 %v383_v30, %v332_v28  ;;  %v1099_v27 = vld [vmem:[%s1445_s11 + $0x10] sm:$0xff]   ;;  %v1100_v28 = vld [vmem:[%s1445_s11 + $0x18] sm:$0xff]   ;;  %v859_v29 = vld [vmem:[%s1447_s10] ss:$0 sm:$0xff] }
  0xb4   :  { %v356_v35 = vadd.f32 %v355_v33, %v309_v31  ;;  %v385_v36 = vadd.f32 %v384_v34, %v333_v32 }
  0xb6   :  { %v357_v37 = vrot.slane %v356_v35, 4  ;;  %v386_v38 = vrot.slane %v385_v36, 4 }
  0xb8   :  { %v358_v39 = vadd.f32 %v357_v37, %v356_v35  ;;  %v387_v40 = vadd.f32 %v386_v38, %v385_v36 }
  0xba   :  { %v359_v41 = vrot.slane %v358_v39, 2  ;;  %v388_v42 = vrot.slane %v387_v40, 2 }
  0xbc   :  { %v360_v43 = vadd.f32 %v359_v41, %v358_v39  ;;  %v389_v44 = vadd.f32 %v388_v42, %v387_v40 }
  0xbe   :  { %v361_v45 = vrot.slane %v360_v43, 1  ;;  %v390_v46 = vrot.slane %v389_v44, 1 }
  0xc0   :  { %v362_v48 = vadd.f32 %v361_v45, %v360_v43  ;;  %v391_v49 = vadd.f32 %v390_v46, %v389_v44 }
  0xc2   :  { %v394_v50 = vadd.f32 %v393_v47, %v362_v48  ;;  %v395_v51 = vadd.f32 %v393_v47, %v391_v49 }
  0xc4   :  { %v396_v52 = vpack.c.bf16 %v394_v50, %v394_v50  ;;  %v397_v53 = vpack.c.bf16 %v395_v51, %v395_v51 }
  0xc6   :  { %v423_v54 = vunpack.c.l.b16 %v396_v52  ;;  %v424_v55 = vunpack.c.l.b16 %v397_v53 }
  0xc8   :  { %v426_v56 = vsel %vm425_vm1, %v424_v55, %v423_v54 }
  0xc9   :  { %v427_v57 = vpack.c.b16 %v426_v56, %v426_v56 }
  0xcb   :  { %1030 = vmatmul.mubr.bf16.vlgmr.msra.gmra.mrb[0].mxu0 %v427_v57 }
  0xcc   :  { %1059 = vmatprep.mubr.msk.bf16.mxu0 %vm1103_vm0, %v1102_v26  ;;  %1058 = vmatpush3.bf16.msra.mxu0 %v1096_v8 }
 0x19e   :  { %v511_v61 = vpop.f32.mrb[0].mxu0 }
 0x19f   :  { %v512_v62 = vadd.f32 %v838_v60, %v511_v61  ;;  %v1031_v63 = vpop.f32.mrb[1].mxu0 }
 0x1a0   :  { %v514_v0 = vpop.f32.mrb[2].mxu0 }
 0x1a1   :  { %v517_v1 = vmax.f32 %v512_v62, 0.0  ;;  %v1032_v2 = vpop.f32.mrb[3].mxu0 }
 0x1a3   :  { %v518_v4 = vpack.c.bf16 %v517_v1, %v517_v1 }
 0x1a5   :  { %1042 = vmatmul.mubr.msk.bf16.vlgmr.msra.gmra.mrb[0].mxu1 %vm558_vm2, %v518_v4 }
 0x1a6   :  { %1046 = vmatpush3.bf16.msra.mxu1 %v1092_v3  ;;  %1053 = vmatprep.mubr.msk.bf16.mxu1 %vm1103_vm0, %v1102_v26 }
 0x1a7   :  { %1047 = vmatprep.subr.bf16.mxu1 %v1102_v26 }
 0x1aa   :  { %1048 = vmatpush3.bf16.msra.mxu1 %v1093_v5 }
 0x1ab   :  { %1049 = vmatprep.subr.bf16.mxu1 %v1102_v26 }
 0x1ae   :  { %1050 = vmatpush3.bf16.msra.mxu1 %v1094_v6 }
 0x1af   :  { %1051 = vmatprep.subr.bf16.mxu1 %v1102_v26 }
 0x1b2   :  { %1052 = vmatpush3.bf16.msra.mxu1 %v1095_v7 }
 0x1b3   :  { %1063 = vmatprep.subr.bf16.mxu1 %v1102_v26 }
 0x278   :  { %v596_v10 = vpop.f32.mrb[0].mxu1 }
 0x279   :  { %v597_v11 = vadd.f32 %v847_v9, %v596_v10  ;;  %v1043_v12 = vpop.f32.mrb[1].mxu1 }
 0x27a   :  { %v599_v13 = vpop.f32.mrb[2].mxu1 }
 0x27b   :  { %v602_v14 = vmax.f32 %v597_v11, 0.0  ;;  %v1044_v15 = vpop.f32.mrb[3].mxu1 }
 0x27d   :  { %v603_v16 = vpack.c.bf16 %v602_v14, %v602_v14 }
 0x27f   :  { %1054 = vmatmul.mubr.msk.bf16.vlgmr.msra.gmra.mrb[4].mxu1 %vm558_vm2, %v603_v16 }
 0x280   :  { %1071 = vmatprep.mubr.msk.bf16.mxu1 %vm1103_vm0, %v1102_v26  ;;  %1064 = vmatpush3.bf16.msra.mxu1 %v1097_v17 }
 0x281   :  { %1065 = vmatprep.subr.bf16.mxu1 %v1102_v26 }
 0x284   :  { %1066 = vmatpush3.bf16.msra.mxu1 %v1098_v18 }
 0x285   :  { %1067 = vmatprep.subr.bf16.mxu1 %v1102_v26 }
 0x288   :  { %1068 = vmatpush3.bf16.msra.mxu1 %v1099_v27 }
 0x289   :  { %1069 = vmatprep.subr.bf16.mxu1 %v1102_v26  ;;  %v862_v26 = vld [vmem:[%s1448_s12] ss:$0 sm:$0xff] }
 0x28c   :  { %1070 = vmatpush3.bf16.msra.mxu1 %v1100_v28 }
 0x352   :  { %v680_v20 = vpop.f32.mrb[4].mxu1 }
 0x353   :  { %v681_v21 = vadd.f32 %v853_v19, %v680_v20  ;;  %v1055_v22 = vpop.f32.mrb[5].mxu1 }
 0x354   :  { %v683_v23 = vpop.f32.mrb[6].mxu1 }
 0x355   :  { %v686_v24 = vpack.c.bf16 %v681_v21, %v681_v21  ;;  %v1056_v25 = vpop.f32.mrb[7].mxu1 }
 0x357   :  { %1060 = vmatmul.mubr.msk.bf16.vlgmr.msra.gmra.mrb[4].mxu0 %vm702_vm3, %v686_v24 }
 0x42a   :  { %v740_v30 = vpop.f32.mrb[4].mxu0 }
 0x42b   :  { %v741_v31 = vadd.f32 %v859_v29, %v740_v30  ;;  %v1061_v32 = vpop.f32.mrb[5].mxu0 }
 0x42c   :  { %v743_v33 = vpop.f32.mrb[6].mxu0 }
 0x42d   :  { %v746_v34 = vmax.f32 %v741_v31, 0.0  ;;  %v1062_v35 = vpop.f32.mrb[7].mxu0 }
 0x42f   :  { %v747_v36 = vpack.c.bf16 %v746_v34, %v746_v34 }
 0x431   :  { %1072 = vmatmul.mubr.msk.bf16.vlgmr.msra.gmra.mrb[8].mxu1 %vm558_vm2, %v747_v36 }
 0x504   :  { %v824_v37 = vpop.f32.mrb[8].mxu1 }
 0x505   :  { %v825_v38 = vadd.f32 %v862_v26, %v824_v37  ;;  %v1073_v39 = vpop.f32.mrb[9].mxu1 }
 0x506   :  { %v827_v40 = vpop.f32.mrb[10].mxu1 }
 0x507   :  { %v830_v41 = vmax.f32 %v825_v38, 0.0  ;;  %v1074_v42 = vpop.f32.mrb[11].mxu1 }
 0x509   :  { %v831_v43 = vpack.c.bf16 %v830_v41, %v830_v41 }
 0x50b   :  { %833 = vst.msk [vmem:[%s1449_s13] sm:$0x1] %vm832_vm4, %v831_v43 }

</bundles_post_ra>
